<compile_context>
chip_gen: v5e
topology: v5e:2x2
jax: 0.10.0
libtpu: 0.0.40
codegen_flags: <defaults>
</compile_context>

<pallas_src>
import functools

import jax
import jax.numpy as jnp
from jax.experimental import pallas as pl
from jax.experimental.pallas import tpu as pltpu


# ---------------------------------------------------------------------------
# Kernel
# ---------------------------------------------------------------------------
def mlp_kernel(x_ref, w1_ref, w2_ref, w3_ref, w4t_ref, b_ref, scal_ref, o_ref):
    # SMEM scalars: PReLU slopes (3) and layer-4 biases (2), read once.
    a0 = scal_ref[0]
    a1 = scal_ref[1]
    a2 = scal_ref[2]
    b4_0 = scal_ref[3]
    b4_1 = scal_ref[4]

    b_all = b_ref[...]            # (3, 256) f32, row i = bias of layer i (zero padded)
    x = x_ref[...]                # (TB, 6) f32
    w1 = w1_ref[...]              # (6, 256) f32

    # ---- Layer 1: Linear(6, 256) on the VPU (K=6 is too small for the MXU) ----
    h = x[:, 0:1] * w1[0:1, :]                      # (TB, 256) f32
    for k in range(1, 6):                            # static unroll
        h = h + x[:, k:k + 1] * w1[k:k + 1, :]
    h = h + b_all[0:1, :]
    h = jnp.where(h >= 0, h, a0 * h)                 # PReLU (Dropout(0) == identity)

    # ---- Layer 2: Linear(256, 128) on the MXU (bf16 x bf16 -> f32 acc) ----
    h = jnp.dot(h.astype(jnp.bfloat16), w2_ref[...],
                preferred_element_type=jnp.float32)
    h = h + b_all[1:2, 0:128]
    h = jnp.where(h >= 0, h, a1 * h)                 # PReLU (Dropout(0) == identity)

    # ---- Layer 3: Linear(128, 64) on the MXU ----
    h = jnp.dot(h.astype(jnp.bfloat16), w3_ref[...],
                preferred_element_type=jnp.float32)
    h = h + b_all[2:3, 0:64]
    h = jnp.where(h >= 0, h, a2 * h)                 # PReLU

    # ---- Layer 4: Linear(64, 2) as two lane reductions (VPU mul + XLU sum) ----
    w4t = w4t_ref[...]                               # (2, 64) f32, torch (out,in) layout
    out0 = jnp.sum(h * w4t[0:1, :], axis=-1, keepdims=True) + b4_0   # (TB, 1)
    out1 = jnp.sum(h * w4t[1:2, :], axis=-1, keepdims=True) + b4_1   # (TB, 1)
    o_ref[:, 0:1] = out0.astype(o_ref.dtype)
    o_ref[:, 1:2] = out1.astype(o_ref.dtype)


# ---------------------------------------------------------------------------
# Wrapper
# ---------------------------------------------------------------------------
def _round_up(n, m):
    return ((n + m - 1) // m) * m


def _cdiv(a, b):
    return (a + b - 1) // b


@functools.partial(jax.jit, static_argnames=("block_batch",))
def net_forward(x, params, *, block_batch=2048):
    """x: (batch, 6) f32 -> (batch, 2) f32."""
    w1, w2, w3, w4t, b_all, scal = params
    batch = x.shape[0]

    # --- Batch tiling: big tiles to amortize per-step overhead, and an even
    # number of grid steps (>=2) when there is enough work so both v7x
    # TensorCores get used via dimension_semantics=("parallel",). ---
    padded8 = _round_up(max(batch, 8), 8)
    if padded8 < 1024:
        tb = padded8                                  # tiny batch: single tile
    else:
        n_tiles = max(2, _cdiv(padded8, block_batch))
        if n_tiles % 2:
            n_tiles += 1                              # even #steps for 2 TCs
        tb = _round_up(_cdiv(padded8, n_tiles), 8)
    grid_n = _cdiv(padded8, tb)
    padded = grid_n * tb
    if padded != batch:
        x = jnp.pad(x, ((0, padded - batch), (0, 0)))

    flops = 2 * padded * (6 * 256 + 256 * 128 + 128 * 64 + 64 * 2)
    bytes_accessed = (
        padded * 6 * 4                                # x
        + padded * 2 * 4                              # narrow output
        + w1.size * 4 + w2.size * 2 + w3.size * 2     # resident weights
        + w4t.size * 4 + b_all.size * 4 + scal.size * 4)

    out = pl.pallas_call(
        mlp_kernel,
        out_shape=jax.ShapeDtypeStruct((padded, 2), jnp.float32),
        grid=(grid_n,),
        in_specs=[
            pl.BlockSpec((tb, 6), lambda i: (i, 0)),        # x: tiled on batch
            pl.BlockSpec(w1.shape, lambda i: (0, 0)),       # weights: resident
            pl.BlockSpec(w2.shape, lambda i: (0, 0)),
            pl.BlockSpec(w3.shape, lambda i: (0, 0)),
            pl.BlockSpec(w4t.shape, lambda i: (0, 0)),
            pl.BlockSpec(b_all.shape, lambda i: (0, 0)),    # packed biases (layers 1-3)
            pl.BlockSpec(memory_space=pltpu.MemorySpace.SMEM),  # PReLU slopes + b4
        ],
        out_specs=pl.BlockSpec((tb, 2), lambda i: (i, 0)),  # narrow exact output
        compiler_params=pltpu.CompilerParams(
            dimension_semantics=("parallel",),
            vmem_limit_bytes=32 * 1024 * 1024),             # v5e default is 16 MiB
        cost_estimate=pl.CostEstimate(
            flops=flops, transcendentals=0, bytes_accessed=bytes_accessed),
    )(x, w1, w2, w3, w4t, b_all, scal)

    return out[:batch]


# ---------------------------------------------------------------------------
# Parameter init (mirrors Net.reset_weights):
#   kaiming_normal_(nonlinearity='relu') on weights (fan_in = in_features),
#   bias = 0.01, PReLU slope = 0.25 (PyTorch default).
#   w1 is kept f32 (VPU layer), w2/w3 are bf16 (in,out) for the MXU,
#   w4t is f32 in torch (out,in) = (2,64) layout for the lane reductions.
# ---------------------------------------------------------------------------
def init_params(key):
    def kaiming(k, fan_in, fan_out):
        std = (2.0 / fan_in) ** 0.5
        return std * jax.random.normal(k, (fan_in, fan_out), dtype=jnp.float32)

    k1, k2, k3, k4 = jax.random.split(key, 4)
    w1 = kaiming(k1, 6, 256)                              # (6, 256)  f32
    w2 = kaiming(k2, 256, 128).astype(jnp.bfloat16)       # (256,128) bf16
    w3 = kaiming(k3, 128, 64).astype(jnp.bfloat16)        # (128, 64) bf16
    w4t = kaiming(k4, 64, 2).T                            # (2, 64)   f32

    b_all = jnp.zeros((3, 256), dtype=jnp.float32)
    for i, width in enumerate((256, 128, 64)):
        b_all = b_all.at[i, :width].set(0.01)

    # [prelu1, prelu2, prelu3, bias4_0, bias4_1]
    scal = jnp.array([0.25, 0.25, 0.25, 0.01, 0.01], dtype=jnp.float32)
    return (w1, w2, w3, w4t, b_all, scal)


# ---------------------------------------------------------------------------
# Pure-JAX reference (same precision scheme: f32 layer 1/4, bf16 MXU layers).
# NOTE: layers 2/3 use bf16 weights/activations with f32 accumulation (TPU
# practice); a strictly-fp32 torch Net would differ slightly more.
# ---------------------------------------------------------------------------
def reference_forward(x, params):
    w1, w2, w3, w4t, b_all, scal = params
    h = jnp.dot(x, w1) + b_all[0:1, 0:256]
    h = jnp.where(h >= 0, h, scal[0] * h)
    h = jnp.dot(h.astype(jnp.bfloat16), w2,
                preferred_element_type=jnp.float32) + b_all[1:2, 0:128]
    h = jnp.where(h >= 0, h, scal[1] * h)
    h = jnp.dot(h.astype(jnp.bfloat16), w3,
                preferred_element_type=jnp.float32) + b_all[2:3, 0:64]
    h = jnp.where(h >= 0, h, scal[2] * h)
    out = jnp.dot(h, w4t.T) + scal[3:5][None, :]
    return out


if __name__ == "__main__":
    key = jax.random.PRNGKey(0)
    key, xk, xk2 = jax.random.split(key, 3)
    params = init_params(key)

    # Small, module-consistent shape: (batch=8, features=6).
    x = jax.random.normal(xk, (8, 6), dtype=jnp.float32)
    out = jax.block_until_ready(net_forward(x, params))
    ref = reference_forward(x, params)
    assert out.shape == (8, 2), out.shape
    assert jnp.allclose(out, ref, atol=2e-3, rtol=2e-3), \
        "mismatch vs JAX reference (batch=8)"

    # Exercise the multi-tile grid (2 parallel steps, resident weights).
    x_big = jax.random.normal(xk2, (2048, 6), dtype=jnp.float32)
    out_big = jax.block_until_ready(net_forward(x_big, params))
    ref_big = reference_forward(x_big, params)
    assert out_big.shape == (2048, 2), out_big.shape
    assert jnp.allclose(out_big, ref_big, atol=2e-3, rtol=2e-3), \
        "mismatch vs JAX reference (batch=2048)"

    print("KERNEL_OK")
</pallas_src>

<mosaic_0001>
module attributes {stable_mosaic.version = 11 : i64} {
  func.func @mlp_kernel(%arg0: i32, %arg1: memref<8x6xf32, #tpu.memory_space<vmem>>, %arg2: memref<6x256xf32, #tpu.memory_space<vmem>>, %arg3: memref<256x128xbf16, #tpu.memory_space<vmem>>, %arg4: memref<128x64xbf16, #tpu.memory_space<vmem>>, %arg5: memref<2x64xf32, #tpu.memory_space<vmem>>, %arg6: memref<3x256xf32, #tpu.memory_space<vmem>>, %arg7: memref<5xf32, #tpu.memory_space<smem>>, %arg8: memref<8x2xf32, #tpu.memory_space<vmem>>) attributes {dimension_semantics = [#tpu.dimension_semantics<parallel>], iteration_bounds = array<i64: 1>, scalar_prefetch = 0 : i64, scratch_operands = 0 : i64, tpu.core_type = #tpu.core_type<tc>, window_params = [{transform_indices = @transform_0, window_bounds = array<i64: 8, 6>}, {pipeline_mode = #tpu.pipeline_mode<synchronous>, transform_indices = @transform_1, window_bounds = array<i64: 6, 256>}, {pipeline_mode = #tpu.pipeline_mode<synchronous>, transform_indices = @transform_2, window_bounds = array<i64: 256, 128>}, {pipeline_mode = #tpu.pipeline_mode<synchronous>, transform_indices = @transform_3, window_bounds = array<i64: 128, 64>}, {pipeline_mode = #tpu.pipeline_mode<synchronous>, transform_indices = @transform_4, window_bounds = array<i64: 2, 64>}, {pipeline_mode = #tpu.pipeline_mode<synchronous>, transform_indices = @transform_5, window_bounds = array<i64: 3, 256>}, {transform_indices = @transform_6, window_bounds = array<i64: 5>}, {transform_indices = @transform_7, window_bounds = array<i64: 8, 2>}]} {
    %c0 = arith.constant 0 : index
    %0 = memref.load %arg7[%c0] : memref<5xf32, #tpu.memory_space<smem>>
    %c1 = arith.constant 1 : index
    %1 = memref.load %arg7[%c1] : memref<5xf32, #tpu.memory_space<smem>>
    %c2 = arith.constant 2 : index
    %2 = memref.load %arg7[%c2] : memref<5xf32, #tpu.memory_space<smem>>
    %c3 = arith.constant 3 : index
    %3 = memref.load %arg7[%c3] : memref<5xf32, #tpu.memory_space<smem>>
    %c4 = arith.constant 4 : index
    %4 = memref.load %arg7[%c4] : memref<5xf32, #tpu.memory_space<smem>>
    %c0_0 = arith.constant 0 : index
    %c0_1 = arith.constant 0 : index
    %5 = vector.load %arg6[%c0_0, %c0_1] : memref<3x256xf32, #tpu.memory_space<vmem>>, vector<3x256xf32>
    %c0_2 = arith.constant 0 : index
    %c0_3 = arith.constant 0 : index
    %6 = vector.load %arg1[%c0_2, %c0_3] : memref<8x6xf32, #tpu.memory_space<vmem>>, vector<8x6xf32>
    %c0_4 = arith.constant 0 : index
    %c0_5 = arith.constant 0 : index
    %7 = vector.load %arg2[%c0_4, %c0_5] : memref<6x256xf32, #tpu.memory_space<vmem>>, vector<6x256xf32>
    %8 = vector.extract_strided_slice %6 {offsets = [0, 0], sizes = [8, 1], strides = [1, 1]} : vector<8x6xf32> to vector<8x1xf32>
    %9 = vector.extract_strided_slice %7 {offsets = [0, 0], sizes = [1, 256], strides = [1, 1]} : vector<6x256xf32> to vector<1x256xf32>
    %10 = vector.broadcast %8 : vector<8x1xf32> to vector<8x256xf32>
    %11 = vector.broadcast %9 : vector<1x256xf32> to vector<8x256xf32>
    %12 = arith.mulf %10, %11 : vector<8x256xf32>
    %13 = vector.extract_strided_slice %6 {offsets = [0, 1], sizes = [8, 1], strides = [1, 1]} : vector<8x6xf32> to vector<8x1xf32>
    %14 = vector.extract_strided_slice %7 {offsets = [1, 0], sizes = [1, 256], strides = [1, 1]} : vector<6x256xf32> to vector<1x256xf32>
    %15 = vector.broadcast %13 : vector<8x1xf32> to vector<8x256xf32>
    %16 = vector.broadcast %14 : vector<1x256xf32> to vector<8x256xf32>
    %17 = arith.mulf %15, %16 : vector<8x256xf32>
    %18 = arith.addf %12, %17 : vector<8x256xf32>
    %19 = vector.extract_strided_slice %6 {offsets = [0, 2], sizes = [8, 1], strides = [1, 1]} : vector<8x6xf32> to vector<8x1xf32>
    %20 = vector.extract_strided_slice %7 {offsets = [2, 0], sizes = [1, 256], strides = [1, 1]} : vector<6x256xf32> to vector<1x256xf32>
    %21 = vector.broadcast %19 : vector<8x1xf32> to vector<8x256xf32>
    %22 = vector.broadcast %20 : vector<1x256xf32> to vector<8x256xf32>
    %23 = arith.mulf %21, %22 : vector<8x256xf32>
    %24 = arith.addf %18, %23 : vector<8x256xf32>
    %25 = vector.extract_strided_slice %6 {offsets = [0, 3], sizes = [8, 1], strides = [1, 1]} : vector<8x6xf32> to vector<8x1xf32>
    %26 = vector.extract_strided_slice %7 {offsets = [3, 0], sizes = [1, 256], strides = [1, 1]} : vector<6x256xf32> to vector<1x256xf32>
    %27 = vector.broadcast %25 : vector<8x1xf32> to vector<8x256xf32>
    %28 = vector.broadcast %26 : vector<1x256xf32> to vector<8x256xf32>
    %29 = arith.mulf %27, %28 : vector<8x256xf32>
    %30 = arith.addf %24, %29 : vector<8x256xf32>
    %31 = vector.extract_strided_slice %6 {offsets = [0, 4], sizes = [8, 1], strides = [1, 1]} : vector<8x6xf32> to vector<8x1xf32>
    %32 = vector.extract_strided_slice %7 {offsets = [4, 0], sizes = [1, 256], strides = [1, 1]} : vector<6x256xf32> to vector<1x256xf32>
    %33 = vector.broadcast %31 : vector<8x1xf32> to vector<8x256xf32>
    %34 = vector.broadcast %32 : vector<1x256xf32> to vector<8x256xf32>
    %35 = arith.mulf %33, %34 : vector<8x256xf32>
    %36 = arith.addf %30, %35 : vector<8x256xf32>
    %37 = vector.extract_strided_slice %6 {offsets = [0, 5], sizes = [8, 1], strides = [1, 1]} : vector<8x6xf32> to vector<8x1xf32>
    %38 = vector.extract_strided_slice %7 {offsets = [5, 0], sizes = [1, 256], strides = [1, 1]} : vector<6x256xf32> to vector<1x256xf32>
    %39 = vector.broadcast %37 : vector<8x1xf32> to vector<8x256xf32>
    %40 = vector.broadcast %38 : vector<1x256xf32> to vector<8x256xf32>
    %41 = arith.mulf %39, %40 : vector<8x256xf32>
    %42 = arith.addf %36, %41 : vector<8x256xf32>
    %43 = vector.extract_strided_slice %5 {offsets = [0, 0], sizes = [1, 256], strides = [1, 1]} : vector<3x256xf32> to vector<1x256xf32>
    %44 = vector.broadcast %43 : vector<1x256xf32> to vector<8x256xf32>
    %45 = arith.addf %42, %44 : vector<8x256xf32>
    %cst = arith.constant 0.000000e+00 : f32
    %46 = vector.broadcast %cst : f32 to vector<8x256xf32>
    %47 = arith.cmpf oge, %45, %46 : vector<8x256xf32>
    %48 = vector.broadcast %0 : f32 to vector<8x256xf32>
    %49 = arith.mulf %48, %45 : vector<8x256xf32>
    %50 = arith.select %47, %45, %49 : vector<8x256xi1>, vector<8x256xf32>
    %51 = arith.truncf %50 : vector<8x256xf32> to vector<8x256xbf16>
    %c0_6 = arith.constant 0 : index
    %c0_7 = arith.constant 0 : index
    %52 = vector.load %arg3[%c0_6, %c0_7] : memref<256x128xbf16, #tpu.memory_space<vmem>>, vector<256x128xbf16>
    %cst_8 = arith.constant dense<0.000000e+00> : vector<8x128xf32>
    %53 = tpu.matmul %51, %52, %cst_8 {dimension_numbers = #tpu.dot_dimension_numbers<[1], [0], [0], [1], [0, 0, 1, 1], [], []>} : vector<8x256xbf16>, vector<256x128xbf16>, vector<8x128xf32> -> vector<8x128xf32>
    %54 = vector.extract_strided_slice %5 {offsets = [1, 0], sizes = [1, 128], strides = [1, 1]} : vector<3x256xf32> to vector<1x128xf32>
    %55 = vector.broadcast %54 : vector<1x128xf32> to vector<8x128xf32>
    %56 = arith.addf %53, %55 : vector<8x128xf32>
    %cst_9 = arith.constant 0.000000e+00 : f32
    %57 = vector.broadcast %cst_9 : f32 to vector<8x128xf32>
    %58 = arith.cmpf oge, %56, %57 : vector<8x128xf32>
    %59 = vector.broadcast %1 : f32 to vector<8x128xf32>
    %60 = arith.mulf %59, %56 : vector<8x128xf32>
    %61 = arith.select %58, %56, %60 : vector<8x128xi1>, vector<8x128xf32>
    %62 = arith.truncf %61 : vector<8x128xf32> to vector<8x128xbf16>
    %c0_10 = arith.constant 0 : index
    %c0_11 = arith.constant 0 : index
    %63 = vector.load %arg4[%c0_10, %c0_11] : memref<128x64xbf16, #tpu.memory_space<vmem>>, vector<128x64xbf16>
    %cst_12 = arith.constant dense<0.000000e+00> : vector<8x64xf32>
    %64 = tpu.matmul %62, %63, %cst_12 {dimension_numbers = #tpu.dot_dimension_numbers<[1], [0], [0], [1], [0, 0, 1, 1], [], []>} : vector<8x128xbf16>, vector<128x64xbf16>, vector<8x64xf32> -> vector<8x64xf32>
    %65 = vector.extract_strided_slice %5 {offsets = [2, 0], sizes = [1, 64], strides = [1, 1]} : vector<3x256xf32> to vector<1x64xf32>
    %66 = vector.broadcast %65 : vector<1x64xf32> to vector<8x64xf32>
    %67 = arith.addf %64, %66 : vector<8x64xf32>
    %cst_13 = arith.constant 0.000000e+00 : f32
    %68 = vector.broadcast %cst_13 : f32 to vector<8x64xf32>
    %69 = arith.cmpf oge, %67, %68 : vector<8x64xf32>
    %70 = vector.broadcast %2 : f32 to vector<8x64xf32>
    %71 = arith.mulf %70, %67 : vector<8x64xf32>
    %72 = arith.select %69, %67, %71 : vector<8x64xi1>, vector<8x64xf32>
    %c0_14 = arith.constant 0 : index
    %c0_15 = arith.constant 0 : index
    %73 = vector.load %arg5[%c0_14, %c0_15] : memref<2x64xf32, #tpu.memory_space<vmem>>, vector<2x64xf32>
    %74 = vector.extract_strided_slice %73 {offsets = [0, 0], sizes = [1, 64], strides = [1, 1]} : vector<2x64xf32> to vector<1x64xf32>
    %75 = vector.broadcast %74 : vector<1x64xf32> to vector<8x64xf32>
    %76 = arith.mulf %72, %75 : vector<8x64xf32>
    %cst_16 = arith.constant dense<0.000000e+00> : vector<8xf32>
    %77 = vector.multi_reduction <add>, %76, %cst_16 [1] : vector<8x64xf32> to vector<8xf32>
    %78 = vector.shape_cast %77 : vector<8xf32> to vector<8x1xf32>
    %79 = vector.broadcast %3 : f32 to vector<8x1xf32>
    %80 = arith.addf %78, %79 : vector<8x1xf32>
    %81 = vector.extract_strided_slice %73 {offsets = [1, 0], sizes = [1, 64], strides = [1, 1]} : vector<2x64xf32> to vector<1x64xf32>
    %82 = vector.broadcast %81 : vector<1x64xf32> to vector<8x64xf32>
    %83 = arith.mulf %72, %82 : vector<8x64xf32>
    %cst_17 = arith.constant dense<0.000000e+00> : vector<8xf32>
    %84 = vector.multi_reduction <add>, %83, %cst_17 [1] : vector<8x64xf32> to vector<8xf32>
    %85 = vector.shape_cast %84 : vector<8xf32> to vector<8x1xf32>
    %86 = vector.broadcast %4 : f32 to vector<8x1xf32>
    %87 = arith.addf %85, %86 : vector<8x1xf32>
    %c0_18 = arith.constant 0 : index
    %c0_19 = arith.constant 0 : index
    %88 = vector.load %arg8[%c0_18, %c0_19] : memref<8x2xf32, #tpu.memory_space<vmem>>, vector<8x1xf32>
    tpu.vector_store %arg8[%c0_18, %c0_19], %80 {strides = array<i32>} : memref<8x2xf32, #tpu.memory_space<vmem>>, vector<8x1xf32>,
    %c0_20 = arith.constant 0 : index
    %c1_21 = arith.constant 1 : index
    %89 = vector.load %arg8[%c0_20, %c1_21] : memref<8x2xf32, #tpu.memory_space<vmem>>, vector<8x1xf32>
    tpu.vector_store %arg8[%c0_20, %c1_21], %87 {strides = array<i32>} : memref<8x2xf32, #tpu.memory_space<vmem>>, vector<8x1xf32>,
    return
  }
  func.func @transform_0(%arg0: i32) -> (i32, i32) {
    %c0_i32 = arith.constant 0 : i32
    %c0_i32_0 = arith.constant 0 : i32
    return %arg0, %c0_i32 : i32, i32
  }
  func.func @transform_1(%arg0: i32) -> (i32, i32) {
    %c0_i32 = arith.constant 0 : i32
    %c0_i32_0 = arith.constant 0 : i32
    %c0_i32_1 = arith.constant 0 : i32
    return %c0_i32, %c0_i32_0 : i32, i32
  }
  func.func @transform_2(%arg0: i32) -> (i32, i32) {
    %c0_i32 = arith.constant 0 : i32
    %c0_i32_0 = arith.constant 0 : i32
    %c0_i32_1 = arith.constant 0 : i32
    return %c0_i32, %c0_i32_0 : i32, i32
  }
  func.func @transform_3(%arg0: i32) -> (i32, i32) {
    %c0_i32 = arith.constant 0 : i32
    %c0_i32_0 = arith.constant 0 : i32
    %c0_i32_1 = arith.constant 0 : i32
    return %c0_i32, %c0_i32_0 : i32, i32
  }
  func.func @transform_4(%arg0: i32) -> (i32, i32) {
    %c0_i32 = arith.constant 0 : i32
    %c0_i32_0 = arith.constant 0 : i32
    %c0_i32_1 = arith.constant 0 : i32
    return %c0_i32, %c0_i32_0 : i32, i32
  }
  func.func @transform_5(%arg0: i32) -> (i32, i32) {
    %c0_i32 = arith.constant 0 : i32
    %c0_i32_0 = arith.constant 0 : i32
    %c0_i32_1 = arith.constant 0 : i32
    return %c0_i32, %c0_i32_0 : i32, i32
  }
  func.func @transform_6(%arg0: i32) -> i32 {
    %c0_i32 = arith.constant 0 : i32
    %c0_i32_0 = arith.constant 0 : i32
    return %c0_i32 : i32
  }
  func.func @transform_7(%arg0: i32) -> (i32, i32) {
    %c0_i32 = arith.constant 0 : i32
    %c0_i32_0 = arith.constant 0 : i32
    return %arg0, %c0_i32 : i32, i32
  }
}

</mosaic_0001>

<bundles_post_ra>
// kernel: net_forward.1
= control target key start
LH: loop header
LB: loop body
LE: loop exit
PB: predicated region body
PF: predicated region fallthrough
CT: control target
= control target key end

     0   :  { %12 = vsyncpa [#allocation3], 0  ;;  %s697_s0 = inlined_call_operand.vmem [shape: f32[8,6], index: 0, kind: input, shape index: {}]   ;;  %s698_s1 = inlined_call_operand.vmem [shape: f32[6,256], index: 1, kind: input, shape index: {}]   ;;  %s699_s2 = inlined_call_operand.hbm [shape: bf16[256,128], index: 2, kind: input, shape index: {}]   ;;  %s700_s3 = inlined_call_operand.vmem [shape: bf16[128,64], index: 3, kind: input, shape index: {}]   ;;  %s701_s4 = inlined_call_operand.vmem [shape: f32[2,64], index: 4, kind: input, shape index: {}]   ;;  %s702_s5 = inlined_call_operand.vmem [shape: f32[3,256], index: 5, kind: input, shape index: {}]   ;;  %s703_s6 = inlined_call_operand.vmem [shape: f32[5], index: 6, kind: input, shape index: {}]   ;;  %s704_s7 = inlined_call_operand.vmem [shape: f32[8,2], index: 7, kind: output, shape index: {}]  }
   0x1   :  { %s22_s26 = sshll.u32 %s699_s2, 4  ;;  %s23_s26 = int_to_ptr.hbm [resolvable:$true] %s22_s26 }
   0x2   :  { %13 = vsyncpa [#allocation4], 0  ;;  %s590_s27 = smov [#allocation2]   ;;  %s42_s8 = sshll.u32 %s703_s6, 4  ;;  %s43_s8 = int_to_ptr.vmem [resolvable:$true] %s42_s8 }
   0x3   :  { %s24_s28 = sshll.u32 %s590_s27, 4  ;;  %s591_s9 = smov 64   ;;  %s25_s28 = int_to_ptr.vmem [resolvable:$true] %s24_s28 }
   0x4   :  { %s592_s10 = smov 4   ;;  %s593_s11 = smov [#allocation5]  }
   0x5   :  { %30 = dma.hbm_to_vmem [thread:$0]  %s23_s26, 2048, %s25_s28, [#allocation3], %s591_s9, %s591_s9, %s592_s10  }
   0x6   :  { %45 = dma.vmem_to_smem %s43_s8, 16, %s593_s11, [#allocation4]  }
   0x7   :  { %586 = dma.done.wait [#allocation3], 2048  }
   0x8   :  { %587 = vsyncadd [#allocation3], 4294965248 }
   0x9   :  { %588 = dma.done.wait [#allocation4], 16  }
   0xa   :  { %589 = vsyncadd [#allocation4], 4294967280 }
   0xb   :  { %54 = sfence }
   0xc   :  { %v61_v0 = vld [vmem:[%s697_s0] sm:$0xff]  ;;  %v516_v1 = vld [vmem:[#allocation2 + $0x38] sm:$0xff]  ;;  %v594_v2 = vmov 0   ;;  %v595_v3 = vmov 2   ;;  %v596_v5 = vmov 4   ;;  %v597_v6 = vmov 1  }
   0xd   :  { %543 = vset.pattern.permute.xlu0 %v594_v2  ;;  %545 = vset.pattern.permute.xlu1 %v595_v3  ;;  %v524_v4 = vld [vmem:[#allocation2 + $0x78] sm:$0xff]  ;;  %v598_v7 = vmov 3   ;;  %v599_v8 = vmov 5   ;;  %v515_v9 = vld [vmem:[#allocation2 + $0x30] sm:$0xff]  ;;  %v514_v11 = vld [vmem:[#allocation2 + $0x28] sm:$0xff]  ;;  %s55_s26 = sld [smem:[#allocation5]] }
   0xe   :  { %66 = vperm.xlu0 %543, %v61_v0   ;;  %84 = vperm.xlu1 %545, %v61_v0   ;;  %v523_v10 = vld [vmem:[#allocation2 + $0x70] sm:$0xff]  ;;  %v522_v12 = vld [vmem:[#allocation2 + $0x68] sm:$0xff]  ;;  %v513_v13 = vld [vmem:[#allocation2 + $0x20] sm:$0xff]  ;;  %s409_s9 = sld [smem:[#allocation5 + $0x1]]  ;;  %vm386_vm4 = vcmask 523264   ;;  %vm399_vm5 = vcmask 7168  }
   0xf   :  { %547 = vset.pattern.permute.xlu2 %v596_v5  ;;  %270 = vmatpush.bf16.msra.mxu0 %v516_v1  ;;  %v521_v14 = vld [vmem:[#allocation2 + $0x60] sm:$0xff]  ;;  %v512_v15 = vld [vmem:[#allocation2 + $0x18] sm:$0xff]  ;;  %v511_v17 = vld [vmem:[#allocation2 + $0x10] sm:$0xff]  ;;  %s410_s10 = sld [smem:[#allocation5 + $0x2]]  ;;  %vm401_vm6 = vcmask 15368  }
  0x10   :  { %104 = vperm.xlu2 %547, %v61_v0   ;;  %283 = vmatpush.bf16.msra.mxu1 %v524_v4  ;;  %v520_v16 = vld [vmem:[#allocation2 + $0x58] sm:$0xff]  ;;  %v519_v18 = vld [vmem:[#allocation2 + $0x50] sm:$0xff]  ;;  %v510_v19 = vld [vmem:[#allocation2 + $0x8] sm:$0xff]  ;;  %s412_s2 = sld [smem:[#allocation5 + $0x4]] }
  0x11   :  { %v518_v20 = vld [vmem:[#allocation2 + $0x48] sm:$0xff]  ;;  %v509_v21 = vld [vmem:[#allocation2] sm:$0xff]  ;;  %v532_v23 = vld [vmem:[%s700_s3 + $0x38] sm:$0xff]  ;;  %s411_s12 = sld [smem:[#allocation5 + $0x3]] }
  0x12   :  { %v517_v22 = vld [vmem:[#allocation2 + $0x40] sm:$0xff]  ;;  %366 = vmatpush.bf16.msra.mxu2 %v532_v23  ;;  %v531_v24 = vld [vmem:[%s700_s3 + $0x30] sm:$0xff]  ;;  %v63_v28 = vld [vmem:[%s698_s1 + $0x8] sm:$0x3f] }
  0x13   :  { %271 = vmatpush.bf16.msra.mxu0 %v515_v9  ;;  %v62_v27 = vld [vmem:[%s698_s1] sm:$0x3f]  ;;  %v530_v30 = vld [vmem:[%s700_s3 + $0x28] sm:$0xff]  ;;  %v70_v32 = vperm.slane %v63_v28, 0  ;;  %v78_v34 = vperm.slane %v63_v28, 1  ;;  %v88_v36 = vperm.slane %v63_v28, 2 }
  0x14   :  { %284 = vmatpush.bf16.msra.mxu1 %v523_v10  ;;  %v69_v31 = vperm.slane %v62_v27, 0  ;;  %v77_v33 = vperm.slane %v62_v27, 1  ;;  %v87_v35 = vperm.slane %v62_v27, 2  ;;  %v529_v37 = vld [vmem:[%s700_s3 + $0x20] sm:$0xff]  ;;  %v97_v38 = vperm.slane %v62_v27, 3  ;;  %v528_v53 = vld [vmem:[%s700_s3 + $0x18] sm:$0xff] }
  0x15   :  { %v98_v39 = vperm.slane %v63_v28, 3  ;;  %v107_v40 = vperm.slane %v62_v27, 4  ;;  %v108_v41 = vperm.slane %v63_v28, 4  ;;  %v117_v50 = vperm.slane %v62_v27, 5  ;;  %v670_v52 = vld [vmem:[%s702_s5] sm:$0x77] }
  0x16   :  { %544 = vset.pattern.permute.xlu0 %v597_v6  ;;  %546 = vset.pattern.permute.xlu1 %v598_v7  ;;  %v118_v51 = vperm.slane %v63_v28, 5  ;;  %v124_v61 = vperm.slane %v670_v52, 0  ;;  %v125_v62 = vperm.slane %v670_v52, 4  ;;  %v527_v1 = vld [vmem:[%s700_s3 + $0x10] sm:$0xff]  ;;  %v173_v23 = vperm.slane %v670_v52, 1 }
  0x17   :  { %74 = vperm.xlu0 %544, %v61_v0   ;;  %94 = vperm.xlu1 %546, %v61_v0   ;;  %v297_v27 = vstv %s409_s9 }
  0x18   :  { %548 = vset.pattern.permute.xlu2 %v599_v8  ;;  %272 = vmatpush.bf16.msra.mxu0 %v514_v11  ;;  %v129_v9 = vperm.slane %v125_v62, 0 }
  0x19   :  { %114 = vperm.xlu2 %548, %v61_v0   ;;  %285 = vmatpush.bf16.msra.mxu1 %v522_v12  ;;  %v134_v12 = vstv %s55_s26 }
  0x1a   :  { %367 = vmatpush.bf16.msra.mxu2 %v531_v24 }
  0x1c   :  { %273 = vmatpush.bf16.msra.mxu0 %v513_v13 }
  0x1d   :  { %286 = vmatpush.bf16.msra.mxu1 %v521_v14 }
  0x1e   :  { %368 = vmatpush.bf16.msra.mxu2 %v530_v30 }
  0x1f   :  { %549 = vset.pattern.permute.xlu0 %v599_v8  ;;  %v128_v8 = vperm.slane %v124_v61, 0 }
  0x20   :  { %274 = vmatpush.bf16.msra.mxu0 %v512_v15 }
  0x21   :  { %287 = vmatpush.bf16.msra.mxu1 %v520_v16 }
  0x22   :  { %369 = vmatpush.bf16.msra.mxu2 %v529_v37  ;;  %v380_v37 = vstv %s410_s10 }
  0x24   :  { %275 = vmatpush.bf16.msra.mxu0 %v511_v17 }
  0x25   :  { %288 = vmatpush.bf16.msra.mxu1 %v519_v18 }
  0x26   :  { %370 = vmatpush.bf16.msra.mxu2 %v528_v53 }
  0x28   :  { %276 = vmatpush.bf16.msra.mxu0 %v510_v19 }
  0x29   :  { %289 = vmatpush.bf16.msra.mxu1 %v518_v20 }
  0x2a   :  { %371 = vmatpush.bf16.msra.mxu2 %v527_v1 }
  0x2c   :  { %277 = vmatpush.bf16.msra.mxu0 %v509_v21  ;;  %v526_v21 = vld [vmem:[%s700_s3 + $0x8] sm:$0xff] }
  0x2d   :  { %290 = vmatpush.bf16.msra.mxu1 %v517_v22  ;;  %v525_v22 = vld [vmem:[%s700_s3] sm:$0xff] }
  0x2e   :  { %372 = vmatpush.bf16.msra.mxu2 %v526_v21 }
  0x32   :  { %373 = vmatpush.bf16.msra.mxu2 %v525_v22 }
  0x6a   :  { %v105_v29 = vpop.permute.xlu2 %104 }
  0x6b   :  { %v109_v63 = vmul.f32 %v107_v40, %v105_v29  ;;  %v110_v0 = vmul.f32 %v108_v41, %v105_v29 }
  0x73   :  { %v115_v58 = vpop.permute.xlu2 %114 }
  0x74   :  { %v119_v4 = vmul.f32 %v117_v50, %v115_v58  ;;  %v120_v5 = vmul.f32 %v118_v51, %v115_v58 }
  0x80   :  { %v67_v25 = vpop.permute.xlu0 %66  ;;  %v85_v26 = vpop.permute.xlu1 %84 }
  0x81   :  { %v71_v44 = vmul.f32 %v69_v31, %v67_v25  ;;  %v72_v45 = vmul.f32 %v70_v32, %v67_v25  ;;  %v89_v48 = vmul.f32 %v87_v35, %v85_v26  ;;  %v90_v49 = vmul.f32 %v88_v36, %v85_v26  ;;  %v383_v35 = vld [vmem:[%s701_s4] sm:$0x3] }
  0x82   :  { %v384_v40 = vperm.slane %v383_v35, 0 }
  0x89   :  { %v75_v42 = vpop.permute.xlu0 %74  ;;  %v95_v43 = vpop.permute.xlu1 %94 }
  0x8a   :  { %v79_v46 = vmul.f32 %v77_v33, %v75_v42  ;;  %v80_v47 = vmul.f32 %v78_v34, %v75_v42  ;;  %v99_v56 = vmul.f32 %v97_v38, %v95_v43  ;;  %v100_v57 = vmul.f32 %v98_v39, %v95_v43 }
  0x8b   :  { %v317_v34 = vperm.slane %v670_v52, 2  ;;  %v392_v39 = vperm.slane %v383_v35, 1 }
  0x8c   :  { %v81_v54 = vadd.f32 %v79_v46, %v71_v44  ;;  %v82_v55 = vadd.f32 %v80_v47, %v72_v45 }
  0x8e   :  { %v91_v59 = vadd.f32 %v89_v48, %v81_v54  ;;  %v92_v60 = vadd.f32 %v90_v49, %v82_v55  ;;  %v397_v48 = vstv %s412_s2  ;;  %v390_v49 = vstv %s411_s12 }
  0x90   :  { %v101_v2 = vadd.f32 %v99_v56, %v91_v59  ;;  %v102_v3 = vadd.f32 %v100_v57, %v92_v60 }
  0x92   :  { %v111_v6 = vadd.f32 %v109_v63, %v101_v2  ;;  %v112_v7 = vadd.f32 %v110_v0, %v102_v3 }
  0x94   :  { %v121_v10 = vadd.f32 %v119_v4, %v111_v6  ;;  %v122_v11 = vadd.f32 %v120_v5, %v112_v7 }
  0x96   :  { %v130_v13 = vadd.f32 %v128_v8, %v121_v10  ;;  %v131_v14 = vadd.f32 %v129_v9, %v122_v11 }
  0x98   :  { %vm132_vm0 = vcmp.ge.f32.partialorder %v130_v13, 0.0  ;;  %v135_v15 = vmul.f32 %v134_v12, %v130_v13  ;;  %vm133_vm1 = vcmp.ge.f32.partialorder %v131_v14, 0.0  ;;  %v136_v16 = vmul.f32 %v134_v12, %v131_v14 }
  0x9a   :  { %v137_v17 = vsel %vm132_vm0, %v130_v13, %v135_v15  ;;  %v138_v18 = vsel %vm133_vm1, %v131_v14, %v136_v16 }
  0x9b   :  { %v139_v19 = vpack.c.bf16 %v137_v17, %v137_v17  ;;  %v140_v20 = vpack.c.bf16 %v138_v18, %v138_v18 }
  0x9d   :  { %278 = vmatmul.bf16.vlgmr.msra.gmra.mxu0 %v139_v19  ;;  %291 = vmatmul.bf16.vlgmr.msra.gmra.mxu1 %v140_v20 }
 0x11a   :  { %v279_v24 = vpop.f32.mrf.mxu0  ;;  %v292_v25 = vpop.f32.mrf.mxu1 }
 0x11b   :  { %v280_v26 = vadd.f32 %v279_v24, %v173_v23 }
 0x11d   :  { %v293_v28 = vadd.f32 %v292_v25, %v280_v26 }
 0x11f   :  { %v298_v29 = vmul.f32 %v297_v27, %v293_v28  ;;  %vm296_vm2 = vcmp.ge.f32.partialorder %v293_v28, 0.0 }
 0x121   :  { %v299_v30 = vsel %vm296_vm2, %v293_v28, %v298_v29 }
 0x122   :  { %v281_v31 = vpop.f32.mrf.mxu0  ;;  %v294_v32 = vpop.f32.mrf.mxu1  ;;  %v300_v33 = vpack.c.bf16 %v299_v30, %v299_v30 }
 0x124   :  { %374 = vmatmul.bf16.vlgmr.msra.gmra.mxu2 %v300_v33 }
 0x1a7   :  { %v375_v36 = vpop.f32.mrf.mxu2 }
 0x1a8   :  { %v376_v38 = vadd.f32 %v375_v36, %v317_v34 }
 0x1aa   :  { %vm379_vm3 = vcmp.ge.f32.partialorder %v376_v38, 0.0  ;;  %v381_v41 = vmul.f32 %v380_v37, %v376_v38 }
 0x1ac   :  { %v382_v42 = vsel %vm379_vm3, %v376_v38, %v381_v41 }
 0x1ad   :  { %v393_v43 = vmul.f32 %v392_v39, %v382_v42  ;;  %v385_v44 = vmul.f32 %v384_v40, %v382_v42 }
 0x1af   :  { %v377_v45 = vpop.f32.mrf.mxu2  ;;  %v394_v46 = vsel %vm386_vm4, %v393_v43, 0.0  ;;  %v387_v47 = vsel %vm386_vm4, %v385_v44, 0.0 }
 0x1b0   :  { %395 = vadd.xlane.f32.xlu2 %v394_v46  ;;  %388 = vadd.xlane.f32.xlu1 %v387_v47 }
 0x223   :  { %v396_v50 = vpop.xlane.xlu2 %395  ;;  %v389_v51 = vpop.xlane.xlu1 %388 }
 0x224   :  { %v398_v52 = vadd.f32 %v397_v48, %v396_v50  ;;  %v391_v53 = vadd.f32 %v390_v49, %v389_v51 }
 0x226   :  { %400 = vst.msk [vmem:[%s704_s7] sm:$0xff] %vm399_vm5, %v391_v53 }
 0x227   :  { %402 = vst.msk [vmem:[%s704_s7] sm:$0xff] %vm401_vm6, %v398_v52 }
 0x228   :  { %407 = vsyncpa [#allocation3], 1 }
 0x229   :  { %408 = vsyncpa [#allocation4], 1 }

</bundles_post_ra>
